<compile_context>
chip_gen: v7x
topology: tpu7x:2x2x1
jax: 0.10.0
libtpu: 0.0.40
codegen_flags: <defaults>
</compile_context>

<pallas_src>
import functools

import jax
import jax.numpy as jnp
import numpy as np
from jax.experimental import pallas as pl
from jax.experimental.pallas import tpu as pltpu


def policy_net_kernel(x_ref, w1_ref, b1_ref, w2_ref, b2_ref, o_ref):
    # Hidden layer: x @ W1 + b1, ReLU.  MXU operands in bf16 (weights arrive bf16,
    # x cast per-tile), f32 accumulation; bias add / ReLU stay in f32.
    x_bf = x_ref[...].astype(jnp.bfloat16)
    h = jnp.dot(x_bf, w1_ref[...], preferred_element_type=jnp.float32) + b1_ref[...]
    h = jnp.maximum(h, 0.0)

    # Output layer: h @ W2 + b2.  W2/b2 arrive already padded to a 128-lane-dense
    # feature dim (pad weights = 0, pad bias = -1e30 -> exp underflows to 0, so the
    # softmax over the real columns is exact).
    logits = (
        jnp.dot(h.astype(jnp.bfloat16), w2_ref[...], preferred_element_type=jnp.float32)
        + b2_ref[...]
    )

    # Numerically stable softmax over the feature axis (dim=1 in the PyTorch module).
    m = jnp.max(logits, axis=-1, keepdims=True)
    e = jnp.exp(logits - m)
    denom = jnp.sum(e, axis=-1, keepdims=True)
    # EUP reciprocal (full precision) instead of a VPU divide over the whole tile.
    o_ref[...] = (e * pl.reciprocal(denom, approx=False)).astype(o_ref.dtype)


def _round_up(v, m):
    return ((v + m - 1) // m) * m


@functools.partial(jax.jit, static_argnames=("block_b",))
def policy_net_forward(x, w1, b1, w2, b2, *, block_b=256):
    B, nS = x.shape
    nH = w1.shape[1]
    nA = w2.shape[1]

    # Don't over-pad tiny batches: clamp the batch tile to round_up(B, 8) (sublane
    # multiple) while keeping the default 256 for large batches.
    block_b = min(block_b, _round_up(B, 8))
    block_b = _round_up(block_b, 8)

    # --- Lane-dense output: pad the action dim to a multiple of 128. --------------
    nA_pad = _round_up(max(nA, 128), 128)
    w2_p = jnp.zeros((nH, nA_pad), jnp.float32).at[:, :nA].set(w2)
    # Pad bias = -1e30 so exp(pad_logit - max) == 0.0 exactly in f32: softmax over the
    # real nA columns is unchanged, and every vector store is unmasked (128 lanes).
    b2_p = jnp.full((1, nA_pad), -1e30, jnp.float32).at[:, :nA].set(b2)

    # Pre-cast weights to bf16 once (resident across grid steps anyway).
    w1_bf = w1.astype(jnp.bfloat16)
    w2_bf = w2_p.astype(jnp.bfloat16)

    # --- Pad batch to a multiple of the batch tile. --------------------------------
    B_pad = _round_up(B, block_b)
    x_p = x if B_pad == B else jnp.zeros((B_pad, nS), x.dtype).at[:B].set(x)

    grid = (B_pad // block_b,)

    cost = pl.CostEstimate(
        flops=2 * B_pad * (nS * nH + nH * nA_pad),
        transcendentals=B_pad * nA_pad,  # exp
        bytes_accessed=(
            4 * (x_p.size + b1.size + b2_p.size + B_pad * nA_pad)
            + 2 * (w1_bf.size + w2_bf.size)
        ),
    )

    out = pl.pallas_call(
        policy_net_kernel,
        out_shape=jax.ShapeDtypeStruct((B_pad, nA_pad), jnp.float32),
        grid_spec=pl.GridSpec(
            grid=grid,
            in_specs=[
                # x: tiled over the batch axis -> double-buffered DMA per grid step.
                pl.BlockSpec((block_b, nS), lambda i: (i, 0)),
                # Weights / biases: full blocks, constant index_map -> VMEM-resident.
                pl.BlockSpec((nS, nH), lambda i: (0, 0)),
                pl.BlockSpec((1, nH), lambda i: (0, 0)),
                pl.BlockSpec((nH, nA_pad), lambda i: (0, 0)),
                pl.BlockSpec((1, nA_pad), lambda i: (0, 0)),
            ],
            out_specs=pl.BlockSpec((block_b, nA_pad), lambda i: (i, 0)),
        ),
        compiler_params=pltpu.CompilerParams(
            # Batch axis is embarrassingly parallel -> shards across v7x's 2 TCs.
            dimension_semantics=("parallel",),
        ),
        cost_estimate=cost,
    )(x_p, w1_bf, b1, w2_bf, b2_p)

    # Drop batch padding and the lane padding of the action dim.
    return out[:B, :nA]


def init_params(key, nS, nH, nA):
    # Deterministic init mimicking nn.Linear's U(-1/sqrt(fan_in), 1/sqrt(fan_in)).
    k1, k2, k3, k4 = jax.random.split(key, 4)
    lim1 = 1.0 / np.sqrt(nS)
    lim2 = 1.0 / np.sqrt(nH)
    w1 = jax.random.uniform(k1, (nS, nH), jnp.float32, -lim1, lim1)
    b1 = jax.random.uniform(k2, (1, nH), jnp.float32, -lim1, lim1)
    w2 = jax.random.uniform(k3, (nH, nA), jnp.float32, -lim2, lim2)
    b2 = jax.random.uniform(k4, (1, nA), jnp.float32, -lim2, lim2)
    return w1, b1, w2, b2


def reference_forward(x, w1, b1, w2, b2):
    h = jnp.maximum(x @ w1 + b1, 0.0)
    return jax.nn.softmax(h @ w2 + b2, axis=1)


if __name__ == "__main__":
    # Small shapes consistent with the module: nS=16 state dims, nH=32 hidden, nA=4 actions.
    nS, nH, nA = 16, 32, 4
    batch = 16

    key = jax.random.PRNGKey(0)
    kx, kp = jax.random.split(key)
    x = jax.random.normal(kx, (batch, nS), jnp.float32)
    w1, b1, w2, b2 = init_params(kp, nS, nH, nA)

    out = policy_net_forward(x, w1, b1, w2, b2)
    out = jax.block_until_ready(out)
    assert out.shape == (batch, nA)

    # bf16 MXU operands (f32 accumulation) -> compare to the f32 reference with a
    # correspondingly looser tolerance; softmax rows must still sum to 1 tightly.
    ref = reference_forward(x, w1, b1, w2, b2)
    np.testing.assert_allclose(np.asarray(out), np.asarray(ref), rtol=1e-2, atol=1e-3)
    np.testing.assert_allclose(
        np.asarray(out).sum(axis=1), np.ones(batch), rtol=1e-5, atol=1e-5
    )

    print("KERNEL_OK")
</pallas_src>

<mosaic_0001>
module attributes {stable_mosaic.version = 11 : i64} {
  func.func @policy_net_kernel(%arg0: i32, %arg1: memref<16x16xf32, #tpu.memory_space<vmem>>, %arg2: memref<16x32xbf16, #tpu.memory_space<vmem>>, %arg3: memref<1x32xf32, #tpu.memory_space<vmem>>, %arg4: memref<32x128xbf16, #tpu.memory_space<vmem>>, %arg5: memref<1x128xf32, #tpu.memory_space<vmem>>, %arg6: memref<16x128xf32, #tpu.memory_space<vmem>>) attributes {dimension_semantics = [#tpu.dimension_semantics<parallel>], iteration_bounds = array<i64: 1>, scalar_prefetch = 0 : i64, scratch_operands = 0 : i64, tpu.core_type = #tpu.core_type<tc>, window_params = [{transform_indices = @transform_0, window_bounds = array<i64: 16, 16>}, {pipeline_mode = #tpu.pipeline_mode<synchronous>, transform_indices = @transform_1, window_bounds = array<i64: 16, 32>}, {pipeline_mode = #tpu.pipeline_mode<synchronous>, transform_indices = @transform_2, window_bounds = array<i64: 1, 32>}, {pipeline_mode = #tpu.pipeline_mode<synchronous>, transform_indices = @transform_3, window_bounds = array<i64: 32, 128>}, {pipeline_mode = #tpu.pipeline_mode<synchronous>, transform_indices = @transform_4, window_bounds = array<i64: 1, 128>}, {transform_indices = @transform_5, window_bounds = array<i64: 16, 128>}]} {
    %c0 = arith.constant 0 : index
    %c0_0 = arith.constant 0 : index
    %0 = vector.load %arg1[%c0, %c0_0] : memref<16x16xf32, #tpu.memory_space<vmem>>, vector<16x16xf32>
    %1 = arith.truncf %0 : vector<16x16xf32> to vector<16x16xbf16>
    %c0_1 = arith.constant 0 : index
    %c0_2 = arith.constant 0 : index
    %2 = vector.load %arg2[%c0_1, %c0_2] : memref<16x32xbf16, #tpu.memory_space<vmem>>, vector<16x32xbf16>
    %cst = arith.constant dense<0.000000e+00> : vector<16x32xf32>
    %3 = tpu.matmul %1, %2, %cst {dimension_numbers = #tpu.dot_dimension_numbers<[1], [0], [0], [1], [0, 0, 1, 1], [], []>} : vector<16x16xbf16>, vector<16x32xbf16>, vector<16x32xf32> -> vector<16x32xf32>
    %c0_3 = arith.constant 0 : index
    %c0_4 = arith.constant 0 : index
    %4 = vector.load %arg3[%c0_3, %c0_4] : memref<1x32xf32, #tpu.memory_space<vmem>>, vector<1x32xf32>
    %5 = vector.broadcast %4 : vector<1x32xf32> to vector<16x32xf32>
    %6 = arith.addf %3, %5 : vector<16x32xf32>
    %cst_5 = arith.constant 0.000000e+00 : f32
    %7 = vector.broadcast %cst_5 : f32 to vector<16x32xf32>
    %8 = arith.maximumf %6, %7 : vector<16x32xf32>
    %9 = arith.truncf %8 : vector<16x32xf32> to vector<16x32xbf16>
    %c0_6 = arith.constant 0 : index
    %c0_7 = arith.constant 0 : index
    %10 = vector.load %arg4[%c0_6, %c0_7] : memref<32x128xbf16, #tpu.memory_space<vmem>>, vector<32x128xbf16>
    %cst_8 = arith.constant dense<0.000000e+00> : vector<16x128xf32>
    %11 = tpu.matmul %9, %10, %cst_8 {dimension_numbers = #tpu.dot_dimension_numbers<[1], [0], [0], [1], [0, 0, 1, 1], [], []>} : vector<16x32xbf16>, vector<32x128xbf16>, vector<16x128xf32> -> vector<16x128xf32>
    %c0_9 = arith.constant 0 : index
    %c0_10 = arith.constant 0 : index
    %12 = vector.load %arg5[%c0_9, %c0_10] : memref<1x128xf32, #tpu.memory_space<vmem>>, vector<1x128xf32>
    %13 = vector.broadcast %12 : vector<1x128xf32> to vector<16x128xf32>
    %14 = arith.addf %11, %13 : vector<16x128xf32>
    %cst_11 = arith.constant dense<0xFF800000> : vector<16xf32>
    %15 = vector.multi_reduction <maximumf>, %14, %cst_11 [1] : vector<16x128xf32> to vector<16xf32>
    %16 = vector.shape_cast %15 : vector<16xf32> to vector<16x1xf32>
    %17 = vector.broadcast %16 : vector<16x1xf32> to vector<16x128xf32>
    %18 = arith.subf %14, %17 : vector<16x128xf32>
    %19 = math.exp %18 : vector<16x128xf32>
    %cst_12 = arith.constant dense<0.000000e+00> : vector<16xf32>
    %20 = vector.multi_reduction <add>, %19, %cst_12 [1] : vector<16x128xf32> to vector<16xf32>
    %21 = vector.shape_cast %20 : vector<16xf32> to vector<16x1xf32>
    %22 = tpu.reciprocal %21 : vector<16x1xf32> -> vector<16x1xf32>
    %23 = vector.broadcast %22 : vector<16x1xf32> to vector<16x128xf32>
    %24 = arith.mulf %19, %23 : vector<16x128xf32>
    %c0_13 = arith.constant 0 : index
    %c0_14 = arith.constant 0 : index
    %25 = vector.load %arg6[%c0_13, %c0_14] : memref<16x128xf32, #tpu.memory_space<vmem>>, vector<16x128xf32>
    tpu.vector_store %arg6[%c0_13, %c0_14], %24 {strides = array<i32>} : memref<16x128xf32, #tpu.memory_space<vmem>>, vector<16x128xf32>,
    return
  }
  func.func @transform_0(%arg0: i32) -> (i32, i32) {
    %c0_i32 = arith.constant 0 : i32
    %c0_i32_0 = arith.constant 0 : i32
    return %arg0, %c0_i32 : i32, i32
  }
  func.func @transform_1(%arg0: i32) -> (i32, i32) {
    %c0_i32 = arith.constant 0 : i32
    %c0_i32_0 = arith.constant 0 : i32
    %c0_i32_1 = arith.constant 0 : i32
    return %c0_i32, %c0_i32_0 : i32, i32
  }
  func.func @transform_2(%arg0: i32) -> (i32, i32) {
    %c0_i32 = arith.constant 0 : i32
    %c0_i32_0 = arith.constant 0 : i32
    %c0_i32_1 = arith.constant 0 : i32
    return %c0_i32, %c0_i32_0 : i32, i32
  }
  func.func @transform_3(%arg0: i32) -> (i32, i32) {
    %c0_i32 = arith.constant 0 : i32
    %c0_i32_0 = arith.constant 0 : i32
    %c0_i32_1 = arith.constant 0 : i32
    return %c0_i32, %c0_i32_0 : i32, i32
  }
  func.func @transform_4(%arg0: i32) -> (i32, i32) {
    %c0_i32 = arith.constant 0 : i32
    %c0_i32_0 = arith.constant 0 : i32
    %c0_i32_1 = arith.constant 0 : i32
    return %c0_i32, %c0_i32_0 : i32, i32
  }
  func.func @transform_5(%arg0: i32) -> (i32, i32) {
    %c0_i32 = arith.constant 0 : i32
    %c0_i32_0 = arith.constant 0 : i32
    return %arg0, %c0_i32 : i32, i32
  }
}

</mosaic_0001>

<bundles_post_ra>
// kernel: policy_net_forward.1
= control target key start
LH: loop header
LB: loop body
LE: loop exit
PB: predicated region body
PF: predicated region fallthrough
CT: control target
= control target key end

     0   :  { %v218_v0 = vmov 0.0   ;;  %vm219_vm0 = vmmov 0   ;;  %vm39_vm1 = vcmask 130048   ;;  %vm110_vm2 = vcmask 261120   ;;  %s277_s1 = inlined_call_operand.vmem [shape: bf16[16,32], index: 1, kind: input, shape index: {}]   ;;  %s278_s0 = inlined_call_operand.vmem [shape: f32[16,16], index: 0, kind: input, shape index: {}]   ;;  %s279_s3 = inlined_call_operand.vmem [shape: bf16[32,128], index: 3, kind: input, shape index: {}]   ;;  %s280_s2 = inlined_call_operand.vmem [shape: f32[1,32], index: 2, kind: input, shape index: {}]   ;;  %s281_s4 = inlined_call_operand.vmem [shape: f32[1,128], index: 4, kind: input, shape index: {}]   ;;  %s282_s5 = inlined_call_operand.vmem [shape: f32[16,128], index: 5, kind: output, shape index: {}]  }
   0x1   :  { %191 = vmatprep.subr.bf16.mxu0 %v218_v0  ;;  %v207_v1 = vld [vmem:[%s277_s1] sm:$0xff]   ;;  %193 = vmatprep.mubr.msk.bf16.mxu0 %vm219_vm0, %v218_v0  ;;  %v22_v3 = vld [vmem:[%s278_s0 + $0x8] sm:$0xff] }
   0x2   :  { %v21_v2 = vld [vmem:[%s278_s0] sm:$0xff]  ;;  %197 = vmatprep.subr.bf16.mxu1 %v218_v0  ;;  %201 = vmatprep.mubr.msk.bf16.mxu1 %vm219_vm0, %v218_v0  ;;  %v209_v6 = vld [vmem:[%s279_s3 + $0x8] sm:$0xff]  }
   0x3   :  { %192 = vmatpush3.bf16.msra.mxu0 %v207_v1  ;;  %v23_v4 = vpack.c.bf16 %v22_v3, %v21_v2  ;;  %v208_v5 = vld [vmem:[%s279_s3] sm:$0xff]  }
   0x4   :  { %198 = vmatpush3.bf16.msra.mxu1 %v208_v5  ;;  %v179_v7 = vld [vmem:[%s280_s2] ss:$0 sm:$0xff] }
   0x5   :  { %199 = vmatprep.subr.bf16.mxu1 %v218_v0  ;;  %v182_v17 = vld [vmem:[%s281_s4] ss:$0 sm:$0xff] }
   0x6   :  { %194 = vmatmul.mubr.msk.bf16.vlgmr.msra.gmra.mrb[0].mxu0 %vm39_vm1, %v23_v4 }
   0x8   :  { %200 = vmatpush3.bf16.msra.mxu1 %v209_v6 }
  0xd9   :  { %v77_v8 = vpop.f32.mrb[0].mxu0 }
  0xda   :  { %v78_v9 = vadd.f32 %v179_v7, %v77_v8  ;;  %v195_v10 = vpop.f32.mrb[1].mxu0 }
  0xdb   :  { %v80_v11 = vpop.f32.mrb[2].mxu0 }
  0xdc   :  { %v81_v12 = vadd.f32 %v179_v7, %v80_v11  ;;  %v196_v13 = vpop.f32.mrb[3].mxu0  ;;  %v84_v14 = vmax.f32 %v78_v9, 0.0 }
  0xde   :  { %v85_v15 = vmax.f32 %v81_v12, 0.0 }
  0xe0   :  { %v86_v16 = vpack.c.bf16 %v85_v15, %v84_v14 }
  0xe2   :  { %202 = vmatmul.mubr.msk.bf16.vlgmr.msra.gmra.mrb[0].mxu1 %vm110_vm2, %v86_v16 }
 0x1b5   :  { %v148_v18 = vpop.f32.mrb[0].mxu1 }
 0x1b6   :  { %v149_v19 = vadd.f32 %v182_v17, %v148_v18  ;;  %v203_v20 = vpop.f32.mrb[1].mxu1 }
 0x1b7   :  { %v151_v21 = vpop.f32.mrb[2].mxu1 }
 0x1b8   :  { %155 = vmax.xlane.f32.xlu0 %v149_v19  ;;  %v204_v22 = vpop.f32.mrb[3].mxu1  ;;  %v152_v23 = vadd.f32 %v182_v17, %v151_v21 }
 0x1bc   :  { %157 = vmax.xlane.f32.xlu0 %v152_v23 }
 0x245   :  { %v156_v24 = vpop.xlane.xlu0 %155 }
 0x246   :  { %v159_v25 = vsub.f32 %v149_v19, %v156_v24 }
 0x248   :  { %v161_v26 = vmul.f32 1.442695, %v159_v25 }
 0x249   :  { %v158_v27 = vpop.xlane.xlu0 %157 }
 0x24a   :  { %210 = vpow2.f32 %v161_v26  ;;  %v160_v28 = vsub.f32 %v152_v23, %v158_v27 }
 0x24c   :  { %v163_v29 = vmul.f32 1.442695, %v160_v28 }
 0x24e   :  { %212 = vpow2.f32 %v163_v29 }
 0x254   :  { %v211_v30 = vpop.eup %210 }
 0x255   :  { %165 = vadd.xlane.f32.xlu1 %v211_v30 }
 0x258   :  { %v213_v31 = vpop.eup %212 }
 0x259   :  { %167 = vadd.xlane.f32.xlu1 %v213_v31 }
 0x2e2   :  { %v166_v32 = vpop.xlane.xlu1 %165 }
 0x2e3   :  { %214 = vrcp.f32 %v166_v32 }
 0x2e6   :  { %v168_v33 = vpop.xlane.xlu1 %167 }
 0x2e7   :  { %216 = vrcp.f32 %v168_v33 }
 0x2ed   :  { %v215_v34 = vpop.eup %214 }
 0x2ee   :  { %v171_v35 = vmul.f32 %v215_v34, %v211_v30 }
 0x2f0   :  { %173 = vst [vmem:[%s282_s5] sm:$0xff] %v171_v35 }
 0x2f1   :  { %v217_v36 = vpop.eup %216 }
 0x2f2   :  { %v172_v37 = vmul.f32 %v217_v36, %v213_v31 }
 0x2f4   :  { %174 = vst [vmem:[%s282_s5 + $0x8] sm:$0xff] %v172_v37 }

</bundles_post_ra>
